<compile_context>
chip_gen: v6e
topology: v6e:2x2x1
jax: 0.10.0
libtpu: 0.0.40
codegen_flags: <defaults>
</compile_context>

<pallas_src>
import functools
import math

import jax
import jax.numpy as jnp
from jax import lax
from jax.experimental import pallas as pl
from jax.experimental.pallas import tpu as pltpu


def _round_up(a, b):
    return (a + b - 1) // b * b


def _conv3x3_kernel(x_ref, w_ref, b_ref, o_ref, col_ref, *,
                    tile_m, wp, cin_pad, use_relu):
    """One (batch element, spatial tile) step of the fused 3x3 conv.

    x_ref:   (Cin_pad, tile_m + halo)  padded input window, spatial in lanes.
    w_ref:   (Cout, 9*Cin_pad)         fused per-tap weights (tap-major K).
    b_ref:   (Cout, 1)                 bias (f32).
    o_ref:   (Cout, tile_m)            lane-dense output tile.
    col_ref: (9*Cin_pad, tile_m)       VMEM scratch for the im2col operand.
    """
    # In-kernel im2col: 9 direct static slices of the input ref, written at
    # sublane-aligned offsets (cin_pad is a multiple of 8).  No value-level
    # `seg` copy, no per-tap casts.
    for kh in range(3):
        for kw in range(3):
            t = kh * 3 + kw
            s = kh * wp + kw                                  # static tap shift
            col_ref[t * cin_pad:(t + 1) * cin_pad, :] = x_ref[:, s:s + tile_m]

    # Single fused GEMM: (Cout, 9*Cin_pad) x (9*Cin_pad, tile_m) -> (Cout, tile_m)
    acc = lax.dot_general(
        w_ref[...], col_ref[...],
        dimension_numbers=(((1,), (0,)), ((), ())),
        preferred_element_type=jnp.float32)

    acc = acc + b_ref[...]                                    # lane-broadcast bias
    if use_relu:
        acc = jnp.maximum(acc, 0.0)
    o_ref[...] = acc.astype(o_ref.dtype)


def _pad_bytes(shape, dtype):
    *lead, sub, lane = shape
    return (math.prod(lead) * _round_up(sub, 8) * _round_up(lane, 128)
            * jnp.dtype(dtype).itemsize)


@functools.partial(jax.jit, static_argnames=("use_relu", "compute_dtype", "tile_m"))
def conv_layer_forward(x, weight, bias, *, use_relu=True,
                       compute_dtype=jnp.bfloat16, tile_m=None):
    """ConvLayer.forward: Conv2d(kernel=3, stride=1, padding=1) [+ ReLU].

    x:      (N, Cin, H, W)    NCHW (PyTorch layout)
    weight: (Cout, Cin, 3, 3) OIHW (nn.Conv2d parameter layout)
    bias:   (Cout,)
    returns (N, Cout, H, W)   NCHW, same dtype as x
    """
    N, Cin, H, W = x.shape
    Cout, Cin_w, KH, KW = weight.shape
    assert (KH, KW) == (3, 3) and Cin_w == Cin, "kernel assumes k=3, s=1, p=1"

    Wp = W + 2                       # padded row stride
    Mc = H * Wp                      # output positions per image on the (H, Wp)
                                     # grid (2 junk columns per row, stripped later)
    halo = 2 * Wp + 2                # largest tap shift (kh=2, kw=2)
    Cin_pad = _round_up(Cin, 8)      # sublane-aligned channel count

    # Spatial tile: lane-dense (multiple of 128); default up to 2048 lanes.
    if tile_m is None:
        tile_m = min(2048, _round_up(Mc, 128))
    tile_m = _round_up(int(tile_m), 128)
    m_tiles = int(pl.cdiv(Mc, tile_m))
    mc_pad = m_tiles * tile_m
    tile_len = tile_m + halo                     # per-tile window incl. halo
    Lp = (m_tiles - 1) * tile_m + tile_len       # flattened padded length needed

    # ---- Wrapper layout glue (cast once to compute dtype; no NHWC transpose,
    # ---- no 9x im2col inflation in HBM) --------------------------------------
    xp = jnp.pad(x.astype(compute_dtype),
                 ((0, 0), (0, 0), (1, 1), (1, 1)))            # (N, Cin, H+2, Wp)
    xf = xp.reshape(N, Cin, (H + 2) * Wp)
    xf = jnp.pad(xf, ((0, 0), (0, Cin_pad - Cin), (0, Lp - (H + 2) * Wp)))

    if m_tiles == 1:
        xt = xf[:, None, :, :]                                # (N, 1, Cin_pad, tile_len)
    else:
        # Overlapping halo'd windows -> per-step VMEM independent of image size.
        idx = (jnp.arange(m_tiles) * tile_m)[:, None] + jnp.arange(tile_len)[None, :]
        xt = jnp.take(xf, idx, axis=2)                        # (N, Cin_pad, m_tiles, tile_len)
        xt = jnp.transpose(xt, (0, 2, 1, 3))                  # (N, m_tiles, Cin_pad, tile_len)

    # Fused weights (Cout, 9*Cin_pad), tap-major K ordering matching the kernel.
    w2 = jnp.transpose(weight, (0, 2, 3, 1))                  # (Cout, 3, 3, Cin)
    w2 = jnp.pad(w2, ((0, 0), (0, 0), (0, 0), (0, Cin_pad - Cin)))
    w2 = w2.reshape(Cout, 9 * Cin_pad).astype(compute_dtype)
    b2 = bias.reshape(Cout, 1).astype(jnp.float32)

    # ---- VMEM budget: actual per-step blocks, clamped to the chip -------------
    est = (2 * _pad_bytes((Cin_pad, tile_len), compute_dtype)      # input tile (x2 buf)
           + 2 * _pad_bytes((Cout, tile_m), x.dtype)               # output tile (x2 buf)
           + 2 * _pad_bytes((Cout, 9 * Cin_pad), compute_dtype)    # weights
           + 2 * _pad_bytes((Cout, 1), jnp.float32)                # bias
           + _pad_bytes((9 * Cin_pad, tile_m), compute_dtype)      # im2col scratch
           + _pad_bytes((Cout, tile_m), jnp.float32))              # f32 accumulator
    try:
        vmem_cap = int(getattr(pltpu.get_tpu_info(), "vmem_capacity_bytes",
                               64 * 2**20))
    except Exception:  # pragma: no cover - conservative fallback
        vmem_cap = 64 * 2**20
    vmem_limit = int(min(max(32 * 2**20, est + 4 * 2**20), (vmem_cap * 85) // 100))

    kernel = functools.partial(
        _conv3x3_kernel, tile_m=tile_m, wp=Wp, cin_pad=Cin_pad, use_relu=use_relu)

    out_flat = pl.pallas_call(
        kernel,
        out_shape=jax.ShapeDtypeStruct((N, Cout, mc_pad), x.dtype),
        grid_spec=pltpu.PrefetchScalarGridSpec(
            num_scalar_prefetch=0,
            grid=(N, m_tiles),
            in_specs=[
                # Per-(n, m) halo'd window; disjoint blocks -> clean pipelining.
                pl.BlockSpec((None, None, Cin_pad, tile_len),
                             lambda n, m: (n, m, 0, 0)),
                pl.BlockSpec((Cout, 9 * Cin_pad), lambda n, m: (0, 0)),
                pl.BlockSpec((Cout, 1), lambda n, m: (0, 0)),
            ],
            out_specs=pl.BlockSpec((None, Cout, tile_m), lambda n, m: (n, 0, m)),
            scratch_shapes=[pltpu.VMEM((9 * Cin_pad, tile_m), compute_dtype)],
        ),
        compiler_params=pltpu.CompilerParams(
            # Every grid step reads/writes its own disjoint blocks, so both axes
            # are safe to shard across TensorCores (no duplicate image DMA).
            dimension_semantics=("parallel", "parallel"),
            vmem_limit_bytes=vmem_limit),
    )(xt, w2, b2)

    # Drop the padded tail and the 2 junk columns per row; already NCHW.
    out = out_flat[:, :, :Mc].reshape(N, Cout, H, Wp)[:, :, :, :W]
    return out


def _reference(x, weight, bias, use_relu=True):
    y = lax.conv_general_dilated(
        x, weight, window_strides=(1, 1), padding=((1, 1), (1, 1)),
        dimension_numbers=("NCHW", "OIHW", "NCHW"),
        precision=lax.Precision.HIGHEST)
    y = y + bias[None, :, None, None]
    if use_relu:
        y = jnp.maximum(y, 0.0)
    return y


if __name__ == "__main__":
    # ConvLayer(in_channels=4, out_channels=8) on a (2, 4, 16, 16) input.
    N, Cin, H, W = 2, 4, 16, 16
    Cout, K = 8, 3

    key = jax.random.PRNGKey(0)
    kx, kwt, kb = jax.random.split(key, 3)
    x = jax.random.normal(kx, (N, Cin, H, W), dtype=jnp.float32)
    weight = jax.random.normal(kwt, (Cout, Cin, K, K), dtype=jnp.float32) * 0.1
    bias = jax.random.normal(kb, (Cout,), dtype=jnp.float32) * 0.1

    ref = _reference(x, weight, bias, use_relu=True)

    # Default (auto) spatial tiling: single tile per image.
    out = jax.block_until_ready(
        conv_layer_forward(x, weight, bias, use_relu=True))
    assert out.shape == (N, Cout, H, W)
    assert jnp.allclose(out, ref, rtol=2e-2, atol=2e-2), "auto-tile mismatch"

    # Forced small tile: exercises the multi-tile halo'd-window path.
    out_tiled = jax.block_until_ready(
        conv_layer_forward(x, weight, bias, use_relu=True, tile_m=128))
    assert jnp.allclose(out_tiled, ref, rtol=2e-2, atol=2e-2), "tiled mismatch"

    print("KERNEL_OK")
</pallas_src>

<mosaic_0001>
module attributes {stable_mosaic.version = 11 : i64} {
  func.func @_conv3x3_kernel(%arg0: i32, %arg1: i32, %arg2: memref<1x1x8x422xbf16, #tpu.memory_space<vmem>>, %arg3: memref<8x72xbf16, #tpu.memory_space<vmem>>, %arg4: memref<8x1xf32, #tpu.memory_space<vmem>>, %arg5: memref<1x8x384xf32, #tpu.memory_space<vmem>>, %arg6: memref<72x384xbf16, #tpu.memory_space<vmem>>) attributes {dimension_semantics = [#tpu.dimension_semantics<parallel>, #tpu.dimension_semantics<parallel>], iteration_bounds = array<i64: 2, 1>, scalar_prefetch = 0 : i64, scratch_operands = 1 : i64, tpu.core_type = #tpu.core_type<tc>, window_params = [{transform_indices = @transform_0, window_bounds = array<i64: 1, 1, 8, 422>}, {pipeline_mode = #tpu.pipeline_mode<synchronous>, transform_indices = @transform_1, window_bounds = array<i64: 8, 72>}, {pipeline_mode = #tpu.pipeline_mode<synchronous>, transform_indices = @transform_2, window_bounds = array<i64: 8, 1>}, {transform_indices = @transform_3, window_bounds = array<i64: 1, 8, 384>}]} {
    %c0 = arith.constant 0 : index
    %c0_0 = arith.constant 0 : index
    %c0_1 = arith.constant 0 : index
    %c0_2 = arith.constant 0 : index
    %0 = vector.load %arg2[%c0, %c0_0, %c0_1, %c0_2] : memref<1x1x8x422xbf16, #tpu.memory_space<vmem>>, vector<1x1x8x384xbf16>
    %1 = vector.shape_cast %0 : vector<1x1x8x384xbf16> to vector<8x384xbf16>
    %c0_3 = arith.constant 0 : index
    %c0_4 = arith.constant 0 : index
    %2 = vector.load %arg6[%c0_3, %c0_4] : memref<72x384xbf16, #tpu.memory_space<vmem>>, vector<8x384xbf16>
    tpu.vector_store %arg6[%c0_3, %c0_4], %1 {strides = array<i32>} : memref<72x384xbf16, #tpu.memory_space<vmem>>, vector<8x384xbf16>,
    %c0_5 = arith.constant 0 : index
    %c0_6 = arith.constant 0 : index
    %c0_7 = arith.constant 0 : index
    %c1 = arith.constant 1 : index
    %3 = vector.load %arg2[%c0_5, %c0_6, %c0_7, %c1] : memref<1x1x8x422xbf16, #tpu.memory_space<vmem>>, vector<1x1x8x384xbf16>
    %4 = vector.shape_cast %3 : vector<1x1x8x384xbf16> to vector<8x384xbf16>
    %c8 = arith.constant 8 : index
    %c0_8 = arith.constant 0 : index
    %5 = vector.load %arg6[%c8, %c0_8] : memref<72x384xbf16, #tpu.memory_space<vmem>>, vector<8x384xbf16>
    tpu.vector_store %arg6[%c8, %c0_8], %4 {strides = array<i32>} : memref<72x384xbf16, #tpu.memory_space<vmem>>, vector<8x384xbf16>,
    %c0_9 = arith.constant 0 : index
    %c0_10 = arith.constant 0 : index
    %c0_11 = arith.constant 0 : index
    %c2 = arith.constant 2 : index
    %6 = vector.load %arg2[%c0_9, %c0_10, %c0_11, %c2] : memref<1x1x8x422xbf16, #tpu.memory_space<vmem>>, vector<1x1x8x384xbf16>
    %7 = vector.shape_cast %6 : vector<1x1x8x384xbf16> to vector<8x384xbf16>
    %c16 = arith.constant 16 : index
    %c0_12 = arith.constant 0 : index
    %8 = vector.load %arg6[%c16, %c0_12] : memref<72x384xbf16, #tpu.memory_space<vmem>>, vector<8x384xbf16>
    tpu.vector_store %arg6[%c16, %c0_12], %7 {strides = array<i32>} : memref<72x384xbf16, #tpu.memory_space<vmem>>, vector<8x384xbf16>,
    %c0_13 = arith.constant 0 : index
    %c0_14 = arith.constant 0 : index
    %c0_15 = arith.constant 0 : index
    %c18 = arith.constant 18 : index
    %9 = vector.load %arg2[%c0_13, %c0_14, %c0_15, %c18] : memref<1x1x8x422xbf16, #tpu.memory_space<vmem>>, vector<1x1x8x384xbf16>
    %10 = vector.shape_cast %9 : vector<1x1x8x384xbf16> to vector<8x384xbf16>
    %c24 = arith.constant 24 : index
    %c0_16 = arith.constant 0 : index
    %11 = vector.load %arg6[%c24, %c0_16] : memref<72x384xbf16, #tpu.memory_space<vmem>>, vector<8x384xbf16>
    tpu.vector_store %arg6[%c24, %c0_16], %10 {strides = array<i32>} : memref<72x384xbf16, #tpu.memory_space<vmem>>, vector<8x384xbf16>,
    %c0_17 = arith.constant 0 : index
    %c0_18 = arith.constant 0 : index
    %c0_19 = arith.constant 0 : index
    %c19 = arith.constant 19 : index
    %12 = vector.load %arg2[%c0_17, %c0_18, %c0_19, %c19] : memref<1x1x8x422xbf16, #tpu.memory_space<vmem>>, vector<1x1x8x384xbf16>
    %13 = vector.shape_cast %12 : vector<1x1x8x384xbf16> to vector<8x384xbf16>
    %c32 = arith.constant 32 : index
    %c0_20 = arith.constant 0 : index
    %14 = vector.load %arg6[%c32, %c0_20] : memref<72x384xbf16, #tpu.memory_space<vmem>>, vector<8x384xbf16>
    tpu.vector_store %arg6[%c32, %c0_20], %13 {strides = array<i32>} : memref<72x384xbf16, #tpu.memory_space<vmem>>, vector<8x384xbf16>,
    %c0_21 = arith.constant 0 : index
    %c0_22 = arith.constant 0 : index
    %c0_23 = arith.constant 0 : index
    %c20 = arith.constant 20 : index
    %15 = vector.load %arg2[%c0_21, %c0_22, %c0_23, %c20] : memref<1x1x8x422xbf16, #tpu.memory_space<vmem>>, vector<1x1x8x384xbf16>
    %16 = vector.shape_cast %15 : vector<1x1x8x384xbf16> to vector<8x384xbf16>
    %c40 = arith.constant 40 : index
    %c0_24 = arith.constant 0 : index
    %17 = vector.load %arg6[%c40, %c0_24] : memref<72x384xbf16, #tpu.memory_space<vmem>>, vector<8x384xbf16>
    tpu.vector_store %arg6[%c40, %c0_24], %16 {strides = array<i32>} : memref<72x384xbf16, #tpu.memory_space<vmem>>, vector<8x384xbf16>,
    %c0_25 = arith.constant 0 : index
    %c0_26 = arith.constant 0 : index
    %c0_27 = arith.constant 0 : index
    %c36 = arith.constant 36 : index
    %18 = vector.load %arg2[%c0_25, %c0_26, %c0_27, %c36] : memref<1x1x8x422xbf16, #tpu.memory_space<vmem>>, vector<1x1x8x384xbf16>
    %19 = vector.shape_cast %18 : vector<1x1x8x384xbf16> to vector<8x384xbf16>
    %c48 = arith.constant 48 : index
    %c0_28 = arith.constant 0 : index
    %20 = vector.load %arg6[%c48, %c0_28] : memref<72x384xbf16, #tpu.memory_space<vmem>>, vector<8x384xbf16>
    tpu.vector_store %arg6[%c48, %c0_28], %19 {strides = array<i32>} : memref<72x384xbf16, #tpu.memory_space<vmem>>, vector<8x384xbf16>,
    %c0_29 = arith.constant 0 : index
    %c0_30 = arith.constant 0 : index
    %c0_31 = arith.constant 0 : index
    %c37 = arith.constant 37 : index
    %21 = vector.load %arg2[%c0_29, %c0_30, %c0_31, %c37] : memref<1x1x8x422xbf16, #tpu.memory_space<vmem>>, vector<1x1x8x384xbf16>
    %22 = vector.shape_cast %21 : vector<1x1x8x384xbf16> to vector<8x384xbf16>
    %c56 = arith.constant 56 : index
    %c0_32 = arith.constant 0 : index
    %23 = vector.load %arg6[%c56, %c0_32] : memref<72x384xbf16, #tpu.memory_space<vmem>>, vector<8x384xbf16>
    tpu.vector_store %arg6[%c56, %c0_32], %22 {strides = array<i32>} : memref<72x384xbf16, #tpu.memory_space<vmem>>, vector<8x384xbf16>,
    %c0_33 = arith.constant 0 : index
    %c0_34 = arith.constant 0 : index
    %c0_35 = arith.constant 0 : index
    %c38 = arith.constant 38 : index
    %24 = vector.load %arg2[%c0_33, %c0_34, %c0_35, %c38] : memref<1x1x8x422xbf16, #tpu.memory_space<vmem>>, vector<1x1x8x384xbf16>
    %25 = vector.shape_cast %24 : vector<1x1x8x384xbf16> to vector<8x384xbf16>
    %c64 = arith.constant 64 : index
    %c0_36 = arith.constant 0 : index
    %26 = vector.load %arg6[%c64, %c0_36] : memref<72x384xbf16, #tpu.memory_space<vmem>>, vector<8x384xbf16>
    tpu.vector_store %arg6[%c64, %c0_36], %25 {strides = array<i32>} : memref<72x384xbf16, #tpu.memory_space<vmem>>, vector<8x384xbf16>,
    %c0_37 = arith.constant 0 : index
    %c0_38 = arith.constant 0 : index
    %27 = vector.load %arg3[%c0_37, %c0_38] : memref<8x72xbf16, #tpu.memory_space<vmem>>, vector<8x72xbf16>
    %c0_39 = arith.constant 0 : index
    %c0_40 = arith.constant 0 : index
    %28 = vector.load %arg6[%c0_39, %c0_40] : memref<72x384xbf16, #tpu.memory_space<vmem>>, vector<72x384xbf16>
    %cst = arith.constant dense<0.000000e+00> : vector<8x384xf32>
    %29 = tpu.matmul %27, %28, %cst {dimension_numbers = #tpu.dot_dimension_numbers<[1], [0], [0], [1], [0, 0, 1, 1], [], []>} : vector<8x72xbf16>, vector<72x384xbf16>, vector<8x384xf32> -> vector<8x384xf32>
    %c0_41 = arith.constant 0 : index
    %c0_42 = arith.constant 0 : index
    %30 = vector.load %arg4[%c0_41, %c0_42] : memref<8x1xf32, #tpu.memory_space<vmem>>, vector<8x1xf32>
    %31 = vector.broadcast %30 : vector<8x1xf32> to vector<8x384xf32>
    %32 = arith.addf %29, %31 : vector<8x384xf32>
    %cst_43 = arith.constant 0.000000e+00 : f32
    %33 = vector.broadcast %cst_43 : f32 to vector<8x384xf32>
    %34 = arith.maximumf %32, %33 : vector<8x384xf32>
    %c0_44 = arith.constant 0 : index
    %c0_45 = arith.constant 0 : index
    %c0_46 = arith.constant 0 : index
    %35 = vector.load %arg5[%c0_44, %c0_45, %c0_46] : memref<1x8x384xf32, #tpu.memory_space<vmem>>, vector<1x8x384xf32>
    %36 = vector.shape_cast %35 : vector<1x8x384xf32> to vector<8x384xf32>
    %37 = vector.shape_cast %34 : vector<8x384xf32> to vector<1x8x384xf32>
    tpu.vector_store %arg5[%c0_44, %c0_45, %c0_46], %37 {strides = array<i32>} : memref<1x8x384xf32, #tpu.memory_space<vmem>>, vector<1x8x384xf32>,
    return
  }
  func.func @transform_0(%arg0: i32, %arg1: i32) -> (i32, i32, i32, i32) {
    %c0_i32 = arith.constant 0 : i32
    %c0_i32_0 = arith.constant 0 : i32
    %c0_i32_1 = arith.constant 0 : i32
    return %arg0, %arg1, %c0_i32, %c0_i32_0 : i32, i32, i32, i32
  }
  func.func @transform_1(%arg0: i32, %arg1: i32) -> (i32, i32) {
    %c0_i32 = arith.constant 0 : i32
    %c0_i32_0 = arith.constant 0 : i32
    %c0_i32_1 = arith.constant 0 : i32
    return %c0_i32, %c0_i32_0 : i32, i32
  }
  func.func @transform_2(%arg0: i32, %arg1: i32) -> (i32, i32) {
    %c0_i32 = arith.constant 0 : i32
    %c0_i32_0 = arith.constant 0 : i32
    %c0_i32_1 = arith.constant 0 : i32
    return %c0_i32, %c0_i32_0 : i32, i32
  }
  func.func @transform_3(%arg0: i32, %arg1: i32) -> (i32, i32, i32) {
    %c0_i32 = arith.constant 0 : i32
    %c0_i32_0 = arith.constant 0 : i32
    return %arg0, %c0_i32, %arg1 : i32, i32, i32
  }
}

</mosaic_0001>

<bundles_post_ra>
// kernel: conv_layer_forward.1
= control target key start
LH: loop header
LB: loop body
LE: loop exit
PB: predicated region body
PF: predicated region fallthrough
CT: control target
= control target key end

     0   :  { %s792_s12 = smov 0   ;;  %s794_s13 = smov 0   ;;  %s864_s0 = inlined_call_operand.vmem [shape: bf16[2,1,8,422], index: 0, kind: input, shape index: {}]   ;;  %s865_s1 = inlined_call_operand.vmem [shape: bf16[8,72], index: 1, kind: input, shape index: {}]   ;;  %s866_s2 = inlined_call_operand.vmem [shape: f32[8,1], index: 2, kind: input, shape index: {}]   ;;  %s867_s3 = inlined_call_operand.vmem [shape: f32[2,8,384], index: 3, kind: output, shape index: {}]  }
   0x1   :  { %s796_s14 = smov 0  }
   0x2 LB: > { %s25_s15 = sadd.s32 1, %s755_s13  ;;  %p650_p0 = scmp.ge.s32.totalorder %s759_s14, 1  ;;  %s759_s14 = sphi %s796_s14, %s13_s14   ;;  %s755_s13 = sphi %s794_s13, %s869_s13   ;;  %s751_s12 = sphi %s792_s12, %s868_s12  }
   0x3   : > { %p27_p1 = scmp.ge.s32.totalorder %s25_s15, 2  ;;  %p157_p2 = scmp.lt.s32.totalorder %s759_s14, 3 }
   0x5   : > { %s871_s15 = smov (%p27_p1, %s25_s15), 0  ;;  %p158_p3 = pnand %p650_p0, %p157_p2 }
   0x6   : > { %p189_p4 = scmp.lt.s32.totalorder (!%p158_p3), %s751_s12, 1  ;;  %s761_s20 = smov (!%p158_p3), 90  }
   0x7   : > { %161 = sbr.rel (%p158_p3) target bundleno = 372 (0x174), region = 32  ;;  %s762_s21 = smov (!%p158_p3), 92  }
   0x8   : > { %s764_s22 = smov (!%p158_p3), 91   ;;  %s765_s23 = smov (!%p158_p3), 109  }
   0x9   : > { %s766_s24 = smov (!%p158_p3), 108   ;;  %s767_s25 = smov (!%p158_p3), 126  }
   0xa   : > { %s768_s26 = smov (!%p158_p3), 110   ;;  %s770_s27 = smov (!%p158_p3), 127  }
   0xc   : > { %s873_s12 = smov (!%p189_p4, %s751_s12), 1  ;;  %v763_v2 = vmov 0.0   ;;  %v769_v4 = vmov 0   ;;  %vm771_vm0 = vmmov 0   ;;  %v377_v5 = vld [vmem:[%s866_s2] sm:$0xff]  ;;  %vm223_vm1 = vcmask 1043456  }
   0xd   : > { %s674_s16 = sshll.u32 %s873_s12, 4  ;;  %681 = vmatprep.subr.bf16.mxu1 %v763_v2  ;;  %501 = vmatprep.mubr.bf16.mxu0 %v769_v4  ;;  %vm351_vm2 = vcmask 736256   ;;  %vm315_vm3 = vcmask 752640   ;;  %vm333_vm4 = vcmask 744448   ;;  %vm279_vm5 = vcmask 891904   ;;  %s695_s5 = smul.u32 24, %s873_s12 }
   0xe   : > { %s197_s19 = scalar_lea.vmem %s864_s0, %s674_s16  ;;  %731 = vset.pattern.permute.xlu0 %v769_v4  ;;  %691 = vmatprep.mubr.msk.bf16.mxu1 %vm771_vm0, %v763_v2  ;;  %vm297_vm6 = vcmask 883712   ;;  %vm243_vm7 = vcmask 1031168   ;;  %vm261_vm8 = vcmask 900096   ;;  %vm225_vm9 = vcmask 1039360  }
   0xf   : > { %v816_v0 = vld [vmem:[%s197_s19] sm:$0xff]  ;;  %v341_v1 = vld [vmem:[%s197_s19 + $0x8] sm:$0xff]  ;;  %vm455_vm10 = vcmask 588800   ;;  %s206_s8 = scalar_lea.vmem %s867_s3, %s695_s5 }
  0x10   : > { %344 = vrot.lane.b32.xlu0 %v816_v0, %s761_s20  ;;  %308 = vrot.lane.b32.xlu1 %v816_v0, %s762_s21  ;;  %v210_v3 = vld [vmem:[%s197_s19 + $0x8] sm:$0xf] }
  0x11   : > { %212 = vst [vmem:[#allocation2 + $0x8] sm:$0xf] %v210_v3 }
  0x14   : > { %346 = vrot.lane.b32.xlu0 %v341_v1, %s761_s20  ;;  %310 = vrot.lane.b32.xlu1 %v341_v1, %s762_s21 }
  0x18   : > { %326 = vrot.lane.b32.xlu0 %v816_v0, %s764_s22  ;;  %328 = vrot.lane.b32.xlu1 %v341_v1, %s764_s22 }
  0x1c   : > { %274 = vrot.lane.b32.xlu1 %v341_v1, %s765_s23  ;;  %272 = vrot.lane.b32.xlu0 %v816_v0, %s765_s23 }
  0x20   : > { %292 = vrot.lane.b32.xlu1 %v341_v1, %s766_s24  ;;  %290 = vrot.lane.b32.xlu0 %v816_v0, %s766_s24 }
  0x24   : > { %238 = vrot.lane.b32.xlu1 %v341_v1, %s767_s25  ;;  %236 = vrot.lane.b32.xlu0 %v816_v0, %s767_s25 }
  0x28   : > { %256 = vrot.lane.b32.xlu1 %v341_v1, %s768_s26  ;;  %254 = vrot.lane.b32.xlu0 %v816_v0, %s768_s26 }
  0x2c   : > { %219 = vrot.lane.b32.xlu1 %v341_v1, %s770_s27  ;;  %217 = vrot.lane.b32.xlu0 %v816_v0, %s770_s27 }
  0x30   : > { %380 = vperm.xlu0 %731, %v377_v5  }
  0x82   : > { %v345_v6 = vpop.permute.xlu0 %344  ;;  %v309_v7 = vpop.permute.xlu1 %308 }
  0x83   : > { %v348_v8 = vrot.slane %v345_v6, 4  ;;  %v312_v11 = vrot.slane %v309_v7, 4 }
  0x86   : > { %v347_v9 = vpop.permute.xlu0 %346  ;;  %v311_v10 = vpop.permute.xlu1 %310 }
  0x87   : > { %v349_v12 = vrot.slane %v347_v9, 4  ;;  %v313_v13 = vrot.slane %v311_v10, 4 }
  0x89   : > { %v350_v14 = vsel %vm223_vm1, %v348_v8, %v349_v12  ;;  %v353_v15 = vsel %vm351_vm2, %v347_v9, %v349_v12  ;;  %v314_v16 = vsel %vm223_vm1, %v312_v11, %v313_v13  ;;  %v317_v17 = vsel %vm315_vm3, %v311_v10, %v313_v13 }
  0x8a   : > { %v352_v18 = vsel %vm351_vm2, %v345_v6, %v350_v14  ;;  %357 = vst [vmem:[#allocation2 + $0x68] sm:$0xf] %v353_v15  ;;  %v316_v19 = vsel %vm315_vm3, %v309_v7, %v314_v16  ;;  %321 = vst [vmem:[#allocation2 + $0x50] sm:$0xf] %v317_v17  ;;  %v327_v20 = vpop.permute.xlu0 %326  ;;  %v329_v21 = vpop.permute.xlu1 %328  ;;  %v358_v16 = vld [vmem:[%s865_s1] sm:$0xf] }
  0x8b   : > { %v330_v22 = vrot.slane %v327_v20, 4  ;;  %v331_v23 = vrot.slane %v329_v21, 4  ;;  %v667_v24 = vcombine.high %v352_v18, %v352_v18  ;;  %v666_v25 = vcombine.low %v352_v18, %v352_v18 }
  0x8d   : > { %v332_v26 = vsel %vm223_vm1, %v330_v22, %v331_v23  ;;  %v335_v27 = vsel %vm333_vm4, %v329_v21, %v331_v23  ;;  %669 = vmatprep.subr.msk.bf16.mxu0 %vm223_vm1, %v667_v24  ;;  %v461_v28 = vsel %vm223_vm1, %v666_v25, 0 }
  0x8e   : > { %v334_v29 = vsel %vm333_vm4, %v327_v20, %v332_v26  ;;  %339 = vst [vmem:[#allocation2 + $0x5c] sm:$0xf] %v335_v27  ;;  %v275_v30 = vpop.permute.xlu1 %274  ;;  %v273_v31 = vpop.permute.xlu0 %272  ;;  %476 = vmatpush1.bf16.msra.mxu0 %v461_v28 }
  0x8f   : > { %v277_v32 = vrot.slane %v275_v30, 4  ;;  %v276_v33 = vrot.slane %v273_v31, 4  ;;  %v664_v34 = vcombine.high %v316_v19, %v334_v29  ;;  %v663_v35 = vcombine.low %v316_v19, %v334_v29 }
  0x91   : > { %v281_v36 = vsel %vm279_vm5, %v275_v30, %v277_v32  ;;  %v278_v37 = vsel %vm223_vm1, %v276_v33, %v277_v32  ;;  %v732_v38 = vld [vmem:[#allocation2 + $0x68] ss:$0 sps:$4 sm:$0xff]   ;;  %477 = vmatprep.subr.bf16.mxu0 %v664_v34 }
  0x92   : > { %285 = vst [vmem:[#allocation2 + $0x38] sm:$0xf] %v281_v36  ;;  %v280_v39 = vsel %vm279_vm5, %v273_v31, %v278_v37  ;;  %v293_v40 = vpop.permute.xlu1 %292  ;;  %v291_v41 = vpop.permute.xlu0 %290  ;;  %478 = vmatpush1.bf16.msra.mxu0 %v663_v35  ;;  %v467_v44 = vsel %vm223_vm1, %v732_v38, 0 }
  0x93   : > { %v295_v42 = vrot.slane %v293_v40, 4  ;;  %v294_v43 = vrot.slane %v291_v41, 4  ;;  %682 = vmatpush3.bf16.msra.mxu1 %v467_v44 }
  0x94   : > { %683 = vmatprep.subr.bf16.mxu1 %v763_v2 }
  0x95   : > { %v299_v45 = vsel %vm297_vm6, %v293_v40, %v295_v42  ;;  %v296_v46 = vsel %vm223_vm1, %v294_v43, %v295_v42  ;;  %v733_v47 = vld [vmem:[#allocation2 + $0x50] ss:$12 sps:$4 sm:$0xff]  }
  0x96   : > { %303 = vst [vmem:[#allocation2 + $0x44] sm:$0xf] %v299_v45  ;;  %v298_v48 = vsel %vm297_vm6, %v291_v41, %v296_v46  ;;  %v239_v49 = vpop.permute.xlu1 %238  ;;  %v237_v50 = vpop.permute.xlu0 %236 }
  0x97   : > { %v241_v51 = vrot.slane %v239_v49, 4  ;;  %v240_v52 = vrot.slane %v237_v50, 4  ;;  %v661_v53 = vcombine.high %v280_v39, %v298_v48  ;;  %v660_v54 = vcombine.low %v280_v39, %v298_v48  ;;  %684 = vmatpush3.bf16.msra.mxu1 %v733_v47 }
  0x98   : > { %685 = vmatprep.subr.bf16.mxu1 %v763_v2 }
  0x99   : > { %v245_v55 = vsel %vm243_vm7, %v239_v49, %v241_v51  ;;  %v242_v56 = vsel %vm223_vm1, %v240_v52, %v241_v51  ;;  %479 = vmatprep.subr.bf16.mxu0 %v661_v53 }
  0x9a   : > { %249 = vst [vmem:[#allocation2 + $0x20] sm:$0xf] %v245_v55  ;;  %v244_v57 = vsel %vm243_vm7, %v237_v50, %v242_v56  ;;  %v257_v58 = vpop.permute.xlu1 %256  ;;  %v255_v59 = vpop.permute.xlu0 %254  ;;  %480 = vmatpush1.bf16.msra.mxu0 %v660_v54 }
  0x9b   : > { %v259_v60 = vrot.slane %v257_v58, 4  ;;  %v258_v61 = vrot.slane %v255_v59, 4 }
  0x9d   : > { %v263_v62 = vsel %vm261_vm8, %v257_v58, %v259_v60  ;;  %v260_v63 = vsel %vm223_vm1, %v258_v61, %v259_v60  ;;  %v734_v1 = vld [vmem:[#allocation2 + $0x38] ss:$12 sps:$4 sm:$0xff]  }
  0x9e   : > { %267 = vst [vmem:[#allocation2 + $0x2c] sm:$0xf] %v263_v62  ;;  %v262_v3 = vsel %vm261_vm8, %v255_v59, %v260_v63  ;;  %v220_v4 = vpop.permute.xlu1 %219  ;;  %v218_v5 = vpop.permute.xlu0 %217  ;;  %686 = vmatpush3.bf16.msra.mxu1 %v734_v1 }
  0x9f   : > { %v222_v6 = vrot.slane %v220_v4, 4  ;;  %v221_v7 = vrot.slane %v218_v5, 4  ;;  %v658_v8 = vcombine.high %v244_v57, %v262_v3  ;;  %v657_v9 = vcombine.low %v244_v57, %v262_v3  ;;  %687 = vmatprep.subr.bf16.mxu1 %v763_v2 }
  0xa1   : > { %v227_v10 = vsel %vm225_vm9, %v220_v4, %v222_v6  ;;  %v224_v11 = vsel %vm223_vm1, %v221_v7, %v222_v6  ;;  %481 = vmatprep.subr.bf16.mxu0 %v658_v8 }
  0xa2   : > { %231 = vst [vmem:[#allocation2 + $0x14] sm:$0xf] %v227_v10  ;;  %v226_v12 = vsel %vm225_vm9, %v218_v5, %v224_v11  ;;  %482 = vmatpush1.bf16.msra.mxu0 %v657_v9 }
  0xa3   : > { %v655_v13 = vcombine.high %v816_v0, %v226_v12  ;;  %v654_v14 = vcombine.low %v816_v0, %v226_v12 }
  0xa5   : > { %v735_v15 = vld [vmem:[#allocation2 + $0x20] ss:$12 sps:$4 sm:$0xff]   ;;  %483 = vmatprep.subr.bf16.mxu0 %v655_v13 }
  0xa6   : > { %484 = vmatpush1.bf16.msra.mxu0 %v654_v14  ;;  %688 = vmatpush3.bf16.msra.mxu1 %v735_v15 }
  0xa7   : > { %689 = vmatprep.subr.bf16.mxu1 %v763_v2 }
  0xa9   : > { %v736_v17 = vld [vmem:[#allocation2 + $0x8] ss:$12 sps:$4 sm:$0xff]   ;;  %670 = vmatmul.mubr.msk.bf16.vlgmr.msra.gmra.mxu0 %vm455_vm10, %v358_v16 }
  0xaa   : > { %690 = vmatpush3.bf16.msra.mxu1 %v736_v17 }
  0xab   : > { %v381_v18 = vpop.permute.xlu0 %380 }
  0xad   : > { %692 = vmatmul.mubr.msk.bf16.vlgmr.msra.gmra.mxu1 %vm455_vm10, %v358_v16 }
 0x169   : > { %v503_v19 = vpop.f32.mrf.mxu0 }
 0x16a   : > { %v504_v20 = vadd.f32 %v503_v19, %v381_v18 }
 0x16b   : > { %v505_v0 = vpop.f32.mrf.mxu0 }
 0x16c   : > { %v550_v21 = vmax.f32 %v504_v20, 0.0  ;;  %v506_v22 = vadd.f32 %v505_v0, %v381_v18 }
 0x16d   : > { %v507_v23 = vpop.f32.mrf.mxu0  ;;  %v544_v24 = vpop.f32.mrf.mxu1 }
 0x16e   : > { %553 = vst [vmem:[%s206_s8] sm:$0xff] %v550_v21  ;;  %v551_v25 = vmax.f32 %v506_v22, 0.0  ;;  %v545_v2 = vadd.f32 %v544_v24, %v381_v18 }
 0x16f   : > { %v508_v26 = vpop.f32.mrf.mxu0  ;;  %v693_v27 = vpop.f32.mrf.mxu1 }
 0x170   : > { %554 = vst [vmem:[%s206_s8 + $0x8] sm:$0xff] %v551_v25  ;;  %v552_v28 = vmax.f32 %v545_v2, 0.0 }
 0x171   : > { %v547_v29 = vpop.f32.mrf.mxu1 }
 0x172   : > { %555 = vst [vmem:[%s206_s8 + $0x10] sm:$0xff] %v552_v28 }
 0x173   : > { %v694_v30 = vpop.f32.mrf.mxu1 }
 0x174 PF: > { %s13_s14 = sadd.s32 1, %s759_s14   ;;  %s868_s12 = smov %s755_s13 }
 0x175   : > { %p10_p5 = scmp.ge.s32.totalorder %s13_s14, 4   ;;  %s869_s13 = smov %s871_s15 }
 0x177   :  { %12 = sbr.rel (!%p10_p5) target bundleno = 2 (0x2), region = 62 }

</bundles_post_ra>
